<compile_context>
chip_gen: v6e
topology: v6e:2x2x1
jax: 0.10.0
libtpu: 0.0.40
codegen_flags: <defaults>
</compile_context>

<pallas_src>
import jax
import jax.numpy as jnp
from jax.experimental import pallas as pl
from jax.experimental.pallas import tpu as pltpu

INPUT_DIM = 512
NUM_CLASSES = 2

# 2048 rows * 512 feats * 4 B = 4 MiB per f32 x tile; 8 MiB double-buffered.
# Safe within the default scoped-VMEM limit on v5e (16 MiB), v6e and v7x
# (32 MiB), no vmem_limit_bytes override required.
_DEFAULT_BLOCK_ROWS = 2048
# Below ~4 MiB of x a standalone pallas_call is pure dispatch/step overhead
# and forfeits fusion with x's producer; plain XLA dot is strictly better.
_SMALL_BATCH_BYTES = 4 << 20
# Keep at least this many grid steps so double-buffering has something to
# overlap and v7x's two TensorCores each get several steps.
_MIN_GRID_STEPS = 4


def _round_up(n, m):
    return ((n + m - 1) // m) * m


def _sublane_multiple(dtype):
    # 8 rows for 32-bit, 16 for 16-bit, 32 for 8-bit element types.
    itemsize = jnp.dtype(dtype).itemsize
    return max(8, 32 // itemsize)


def _linear_kernel(x_ref, w_ref, b_ref, o_ref):
    # x_ref: (TB, 512), w_ref: (512, 2), b_ref: (1, 2), o_ref: (TB, 2)
    acc = jnp.dot(x_ref[...], w_ref[...], preferred_element_type=jnp.float32)
    o_ref[...] = (acc + b_ref[...].astype(jnp.float32)).astype(o_ref.dtype)


def _pallas_linear(x, w_t, b2d, block_rows):
    """x: (B, 512), w_t: (512, 2) same dtype as x, b2d: (1, 2) f32 -> (B, 2) f32."""
    B = x.shape[0]
    sub = _sublane_multiple(x.dtype)

    block_rows = max(sub, _round_up(block_rows, sub))
    # Cap tb so the grid keeps >= _MIN_GRID_STEPS steps (pipeline overlap +
    # v7x two-TC split), but never exceed the (rounded-up) batch itself.
    tb_cap = _round_up(pl.cdiv(B, _MIN_GRID_STEPS), sub)
    tb = max(sub, min(block_rows, tb_cap, _round_up(B, sub)))

    grid = (pl.cdiv(B, tb),)  # last block may be partial; no padding of x

    return pl.pallas_call(
        _linear_kernel,
        out_shape=jax.ShapeDtypeStruct((B, NUM_CLASSES), jnp.float32),
        grid=grid,
        in_specs=[
            pl.BlockSpec((tb, INPUT_DIM), lambda i: (i, 0)),           # x: streamed
            pl.BlockSpec((INPUT_DIM, NUM_CLASSES), lambda i: (0, 0)),  # W^T: resident
            pl.BlockSpec((1, NUM_CLASSES), lambda i: (0, 0)),          # bias: resident
        ],
        out_specs=pl.BlockSpec((tb, NUM_CLASSES), lambda i: (i, 0)),
        compiler_params=pltpu.CompilerParams(
            dimension_semantics=("parallel",),  # v7x: shard batch over both TCs
        ),
    )(x, w_t, b2d)


def verif_net_forward(x, w_t, b, *, block_rows=_DEFAULT_BLOCK_ROWS,
                      force_pallas=False):
    """Forward pass of verif_net (eval mode).

    x:   (B, 512) f32 or bf16
    w_t: (512, 2) classifier weight, pre-transposed
    b:   (2,)     bias
    returns: (B, 2) f32 logits
    """
    B = x.shape[0]
    w_t = w_t.astype(x.dtype)  # tiny (4 KiB); keeps a native MXU dtype pass
    b2d = b.astype(jnp.float32).reshape(1, NUM_CLASSES)

    x_bytes = B * INPUT_DIM * jnp.dtype(x.dtype).itemsize
    if (not force_pallas) and x_bytes < _SMALL_BATCH_BYTES:
        # Small/medium batch: plain XLA dot fuses with the producer of x.
        acc = jnp.dot(x, w_t, preferred_element_type=jnp.float32)
        return acc + b2d

    return _pallas_linear(x, w_t, b2d, block_rows)


def init_params(key):
    # Matches weights_init_classifier: weight ~ N(0, std=0.001), bias = 0.
    w = jax.random.normal(key, (NUM_CLASSES, INPUT_DIM), dtype=jnp.float32) * 0.001
    b = jnp.zeros((NUM_CLASSES,), dtype=jnp.float32)
    return w, b


if __name__ == "__main__":
    key = jax.random.PRNGKey(0)
    k_w, k_x1, k_x2, k_x3 = jax.random.split(key, 4)

    w, b = init_params(k_w)
    w_t = w.T  # (512, 2)

    # Case 1: tiny batch, single tile (forces the Pallas path).
    B1 = 8
    x1 = jax.random.normal(k_x1, (B1, INPUT_DIM), dtype=jnp.float32)
    out1 = jax.block_until_ready(verif_net_forward(x1, w_t, b, force_pallas=True))
    ref1 = x1 @ w_t + b
    assert out1.shape == (B1, NUM_CLASSES), out1.shape
    assert jnp.allclose(out1, ref1, atol=1e-5, rtol=1e-5), "mismatch (B=8)"

    # Case 2: ragged batch, multi-step grid with a partial last block
    # (no jnp.pad of x). Small block_rows keeps the demo tiny.
    B2 = 300
    x2 = jax.random.normal(k_x2, (B2, INPUT_DIM), dtype=jnp.float32)
    out2 = jax.block_until_ready(
        verif_net_forward(x2, w_t, b, block_rows=128, force_pallas=True))
    ref2 = x2 @ w_t + b
    assert out2.shape == (B2, NUM_CLASSES), out2.shape
    assert jnp.allclose(out2, ref2, atol=1e-5, rtol=1e-5), "mismatch (B=300)"

    # Case 3: bf16 x stream (dtype-aware 16-row sublane rounding, f32 accum).
    B3 = 100
    x3 = jax.random.normal(k_x3, (B3, INPUT_DIM), dtype=jnp.float32).astype(jnp.bfloat16)
    out3 = jax.block_until_ready(verif_net_forward(x3, w_t, b, force_pallas=True))
    ref3 = jnp.dot(x3.astype(jnp.float32),
                   w_t.astype(jnp.bfloat16).astype(jnp.float32)) + b
    assert out3.shape == (B3, NUM_CLASSES), out3.shape
    assert out3.dtype == jnp.float32, out3.dtype
    assert jnp.allclose(out3, ref3, atol=1e-3, rtol=1e-3), "mismatch (bf16 B=100)"

    print("KERNEL_OK")
</pallas_src>

<mosaic_0001>
module attributes {stable_mosaic.version = 11 : i64} {
  func.func @_linear_kernel(%arg0: i32, %arg1: memref<8x512xf32, #tpu.memory_space<vmem>>, %arg2: memref<512x2xf32, #tpu.memory_space<vmem>>, %arg3: memref<1x2xf32, #tpu.memory_space<vmem>>, %arg4: memref<8x2xf32, #tpu.memory_space<vmem>>) attributes {dimension_semantics = [#tpu.dimension_semantics<parallel>], iteration_bounds = array<i64: 1>, scalar_prefetch = 0 : i64, scratch_operands = 0 : i64, tpu.core_type = #tpu.core_type<tc>, window_params = [{transform_indices = @transform_0, window_bounds = array<i64: 8, 512>}, {pipeline_mode = #tpu.pipeline_mode<synchronous>, transform_indices = @transform_1, window_bounds = array<i64: 512, 2>}, {pipeline_mode = #tpu.pipeline_mode<synchronous>, transform_indices = @transform_2, window_bounds = array<i64: 1, 2>}, {transform_indices = @transform_3, window_bounds = array<i64: 8, 2>}]} {
    %c0 = arith.constant 0 : index
    %c0_0 = arith.constant 0 : index
    %0 = vector.load %arg1[%c0, %c0_0] : memref<8x512xf32, #tpu.memory_space<vmem>>, vector<8x512xf32>
    %c0_1 = arith.constant 0 : index
    %c0_2 = arith.constant 0 : index
    %1 = vector.load %arg2[%c0_1, %c0_2] : memref<512x2xf32, #tpu.memory_space<vmem>>, vector<512x2xf32>
    %cst = arith.constant dense<0.000000e+00> : vector<8x2xf32>
    %2 = tpu.matmul %0, %1, %cst {dimension_numbers = #tpu.dot_dimension_numbers<[1], [0], [0], [1], [0, 0, 1, 1], [], []>} : vector<8x512xf32>, vector<512x2xf32>, vector<8x2xf32> -> vector<8x2xf32>
    %c0_3 = arith.constant 0 : index
    %c0_4 = arith.constant 0 : index
    %3 = vector.load %arg3[%c0_3, %c0_4] : memref<1x2xf32, #tpu.memory_space<vmem>>, vector<1x2xf32>
    %4 = vector.broadcast %3 : vector<1x2xf32> to vector<8x2xf32>
    %5 = arith.addf %2, %4 : vector<8x2xf32>
    %c0_5 = arith.constant 0 : index
    %c0_6 = arith.constant 0 : index
    %6 = vector.load %arg4[%c0_5, %c0_6] : memref<8x2xf32, #tpu.memory_space<vmem>>, vector<8x2xf32>
    tpu.vector_store %arg4[%c0_5, %c0_6], %5 {strides = array<i32>} : memref<8x2xf32, #tpu.memory_space<vmem>>, vector<8x2xf32>,
    return
  }
  func.func @transform_0(%arg0: i32) -> (i32, i32) {
    %c0_i32 = arith.constant 0 : i32
    %c0_i32_0 = arith.constant 0 : i32
    return %arg0, %c0_i32 : i32, i32
  }
  func.func @transform_1(%arg0: i32) -> (i32, i32) {
    %c0_i32 = arith.constant 0 : i32
    %c0_i32_0 = arith.constant 0 : i32
    %c0_i32_1 = arith.constant 0 : i32
    return %c0_i32, %c0_i32_0 : i32, i32
  }
  func.func @transform_2(%arg0: i32) -> (i32, i32) {
    %c0_i32 = arith.constant 0 : i32
    %c0_i32_0 = arith.constant 0 : i32
    %c0_i32_1 = arith.constant 0 : i32
    return %c0_i32, %c0_i32_0 : i32, i32
  }
  func.func @transform_3(%arg0: i32) -> (i32, i32) {
    %c0_i32 = arith.constant 0 : i32
    %c0_i32_0 = arith.constant 0 : i32
    return %arg0, %c0_i32 : i32, i32
  }
}

</mosaic_0001>

<bundles_post_ra>
// kernel: tpu_custom_call.1
= control target key start
LH: loop header
LB: loop body
LE: loop exit
PB: predicated region body
PF: predicated region fallthrough
CT: control target
= control target key end

     0   :  { %vm229_vm0 = vcmask 15360   ;;  %s536_s1 = inlined_call_operand.vmem [shape: f32[512,2], index: 1, kind: input, shape index: {}]   ;;  %s537_s0 = inlined_call_operand.vmem [shape: f32[8,512], index: 0, kind: input, shape index: {}]   ;;  %s538_s2 = inlined_call_operand.vmem [shape: f32[1,2], index: 2, kind: input, shape index: {}]   ;;  %s539_s3 = inlined_call_operand.vmem [shape: f32[8,2], index: 3, kind: output, shape index: {}]  }
   0x1   :  { %v49_v0 = vld [vmem:[%s536_s1 + $0xf8] sm:$0xff]  ;;  %v48_v4 = vld [vmem:[%s536_s1 + $0xf0] sm:$0xff]  ;;  %v47_v8 = vld [vmem:[%s536_s1 + $0xe8] sm:$0xff] }
   0x2   :  { %v81_v1 = vld [vmem:[%s536_s1 + $0x1f8] sm:$0xff]  ;;  %236 = vmatprep.subr.mxu0 %v49_v0  ;;  %v80_v5 = vld [vmem:[%s536_s1 + $0x1f0] sm:$0xff]  ;;  %v79_v9 = vld [vmem:[%s536_s1 + $0x1e8] sm:$0xff] }
   0x3   :  { %v33_v2 = vld [vmem:[%s536_s1 + $0x78] sm:$0xff]  ;;  %271 = vmatprep.subr.mxu1 %v81_v1  ;;  %v32_v6 = vld [vmem:[%s536_s1 + $0x70] sm:$0xff]  ;;  %v31_v10 = vld [vmem:[%s536_s1 + $0x68] sm:$0xff] }
   0x4   :  { %v65_v3 = vld [vmem:[%s536_s1 + $0x178] sm:$0xff]  ;;  %237 = vmatpush3.msra.mxu0 %v33_v2  ;;  %v64_v7 = vld [vmem:[%s536_s1 + $0x170] sm:$0xff]  ;;  %v63_v11 = vld [vmem:[%s536_s1 + $0x168] sm:$0xff] }
   0x5   :  { %272 = vmatpush3.msra.mxu1 %v65_v3  ;;  %238 = vmatprep.subr.mxu0 %v48_v4  ;;  %v46_v12 = vld [vmem:[%s536_s1 + $0xe0] sm:$0xff]  ;;  %v45_v16 = vld [vmem:[%s536_s1 + $0xd8] sm:$0xff]  ;;  %v44_v20 = vld [vmem:[%s536_s1 + $0xd0] sm:$0xff] }
   0x6   :  { %273 = vmatprep.subr.mxu1 %v80_v5  ;;  %239 = vmatpush3.msra.mxu0 %v32_v6  ;;  %v78_v13 = vld [vmem:[%s536_s1 + $0x1e0] sm:$0xff]  ;;  %v77_v17 = vld [vmem:[%s536_s1 + $0x1d8] sm:$0xff]  ;;  %v76_v21 = vld [vmem:[%s536_s1 + $0x1d0] sm:$0xff] }
   0x7   :  { %274 = vmatpush3.msra.mxu1 %v64_v7  ;;  %240 = vmatprep.subr.mxu0 %v47_v8  ;;  %v30_v14 = vld [vmem:[%s536_s1 + $0x60] sm:$0xff]  ;;  %v29_v18 = vld [vmem:[%s536_s1 + $0x58] sm:$0xff]  ;;  %v28_v22 = vld [vmem:[%s536_s1 + $0x50] sm:$0xff] }
   0x8   :  { %275 = vmatprep.subr.mxu1 %v79_v9  ;;  %v62_v15 = vld [vmem:[%s536_s1 + $0x160] sm:$0xff]  ;;  %241 = vmatpush3.msra.mxu0 %v31_v10  ;;  %v61_v19 = vld [vmem:[%s536_s1 + $0x158] sm:$0xff]  ;;  %v60_v23 = vld [vmem:[%s536_s1 + $0x150] sm:$0xff] }
   0x9   :  { %276 = vmatpush3.msra.mxu1 %v63_v11  ;;  %242 = vmatprep.subr.mxu0 %v46_v12  ;;  %v43_v24 = vld [vmem:[%s536_s1 + $0xc8] sm:$0xff]  ;;  %v42_v28 = vld [vmem:[%s536_s1 + $0xc0] sm:$0xff]  ;;  %v41_v32 = vld [vmem:[%s536_s1 + $0xb8] sm:$0xff] }
   0xa   :  { %277 = vmatprep.subr.mxu1 %v78_v13  ;;  %243 = vmatpush3.msra.mxu0 %v30_v14  ;;  %v75_v25 = vld [vmem:[%s536_s1 + $0x1c8] sm:$0xff]  ;;  %v74_v29 = vld [vmem:[%s536_s1 + $0x1c0] sm:$0xff]  ;;  %v73_v33 = vld [vmem:[%s536_s1 + $0x1b8] sm:$0xff] }
   0xb   :  { %278 = vmatpush3.msra.mxu1 %v62_v15  ;;  %244 = vmatprep.subr.mxu0 %v45_v16  ;;  %v27_v26 = vld [vmem:[%s536_s1 + $0x48] sm:$0xff]  ;;  %v26_v30 = vld [vmem:[%s536_s1 + $0x40] sm:$0xff]  ;;  %v25_v34 = vld [vmem:[%s536_s1 + $0x38] sm:$0xff] }
   0xc   :  { %279 = vmatprep.subr.mxu1 %v77_v17  ;;  %245 = vmatpush3.msra.mxu0 %v29_v18  ;;  %v59_v27 = vld [vmem:[%s536_s1 + $0x148] sm:$0xff]  ;;  %v58_v31 = vld [vmem:[%s536_s1 + $0x140] sm:$0xff]  ;;  %v57_v35 = vld [vmem:[%s536_s1 + $0x138] sm:$0xff] }
   0xd   :  { %280 = vmatpush3.msra.mxu1 %v61_v19  ;;  %246 = vmatprep.subr.mxu0 %v44_v20  ;;  %v40_v36 = vld [vmem:[%s536_s1 + $0xb0] sm:$0xff]  ;;  %v39_v40 = vld [vmem:[%s536_s1 + $0xa8] sm:$0xff]  ;;  %v38_v44 = vld [vmem:[%s536_s1 + $0xa0] sm:$0xff] }
   0xe   :  { %281 = vmatprep.subr.mxu1 %v76_v21  ;;  %247 = vmatpush3.msra.mxu0 %v28_v22  ;;  %v72_v37 = vld [vmem:[%s536_s1 + $0x1b0] sm:$0xff]  ;;  %v71_v41 = vld [vmem:[%s536_s1 + $0x1a8] sm:$0xff]  ;;  %v70_v45 = vld [vmem:[%s536_s1 + $0x1a0] sm:$0xff] }
   0xf   :  { %282 = vmatpush3.msra.mxu1 %v60_v23  ;;  %248 = vmatprep.subr.mxu0 %v43_v24  ;;  %v24_v38 = vld [vmem:[%s536_s1 + $0x30] sm:$0xff]  ;;  %v23_v42 = vld [vmem:[%s536_s1 + $0x28] sm:$0xff]  ;;  %v22_v46 = vld [vmem:[%s536_s1 + $0x20] sm:$0xff] }
  0x10   :  { %283 = vmatprep.subr.mxu1 %v75_v25  ;;  %249 = vmatpush3.msra.mxu0 %v27_v26  ;;  %v56_v39 = vld [vmem:[%s536_s1 + $0x130] sm:$0xff]  ;;  %v55_v43 = vld [vmem:[%s536_s1 + $0x128] sm:$0xff]  ;;  %v54_v47 = vld [vmem:[%s536_s1 + $0x120] sm:$0xff] }
  0x11   :  { %284 = vmatpush3.msra.mxu1 %v59_v27  ;;  %250 = vmatprep.subr.mxu0 %v42_v28  ;;  %v37_v48 = vld [vmem:[%s536_s1 + $0x98] sm:$0xff]  ;;  %v36_v52 = vld [vmem:[%s536_s1 + $0x90] sm:$0xff]  ;;  %v35_v56 = vld [vmem:[%s536_s1 + $0x88] sm:$0xff] }
  0x12   :  { %285 = vmatprep.subr.mxu1 %v74_v29  ;;  %251 = vmatpush3.msra.mxu0 %v26_v30  ;;  %v69_v49 = vld [vmem:[%s536_s1 + $0x198] sm:$0xff]  ;;  %v68_v53 = vld [vmem:[%s536_s1 + $0x190] sm:$0xff]  ;;  %v67_v57 = vld [vmem:[%s536_s1 + $0x188] sm:$0xff] }
  0x13   :  { %286 = vmatpush3.msra.mxu1 %v58_v31  ;;  %252 = vmatprep.subr.mxu0 %v41_v32  ;;  %v21_v50 = vld [vmem:[%s536_s1 + $0x18] sm:$0xff]  ;;  %v20_v54 = vld [vmem:[%s536_s1 + $0x10] sm:$0xff]  ;;  %v19_v58 = vld [vmem:[%s536_s1 + $0x8] sm:$0xff] }
  0x14   :  { %287 = vmatprep.subr.mxu1 %v73_v33  ;;  %253 = vmatpush3.msra.mxu0 %v25_v34  ;;  %v53_v51 = vld [vmem:[%s536_s1 + $0x118] sm:$0xff]  ;;  %v52_v55 = vld [vmem:[%s536_s1 + $0x110] sm:$0xff]  ;;  %v51_v59 = vld [vmem:[%s536_s1 + $0x108] sm:$0xff] }
  0x15   :  { %288 = vmatpush3.msra.mxu1 %v57_v35  ;;  %254 = vmatprep.subr.mxu0 %v40_v36  ;;  %v34_v60 = vld [vmem:[%s536_s1 + $0x80] sm:$0xff]  ;;  %v15_v63 = vld [vmem:[%s537_s0 + $0x8] sm:$0xff]  ;;  %v17_v1 = vld [vmem:[%s537_s0 + $0x18] sm:$0xff] }
  0x16   :  { %289 = vmatprep.subr.mxu1 %v72_v37  ;;  %255 = vmatpush3.msra.mxu0 %v24_v38  ;;  %v66_v61 = vld [vmem:[%s536_s1 + $0x180] sm:$0xff]  ;;  %v16_v3 = vld [vmem:[%s537_s0 + $0x10] sm:$0xff] }
  0x17   :  { %290 = vmatpush3.msra.mxu1 %v56_v39  ;;  %256 = vmatprep.subr.mxu0 %v39_v40  ;;  %v18_v62 = vld [vmem:[%s536_s1] sm:$0xff] }
  0x18   :  { %291 = vmatprep.subr.mxu1 %v71_v41  ;;  %257 = vmatpush3.msra.mxu0 %v23_v42  ;;  %v50_v0 = vld [vmem:[%s536_s1 + $0x100] sm:$0xff] }
  0x19   :  { %292 = vmatpush3.msra.mxu1 %v55_v43  ;;  %258 = vmatprep.subr.mxu0 %v38_v44  ;;  %v14_v2 = vld [vmem:[%s537_s0] sm:$0xff] }
  0x1a   :  { %293 = vmatprep.subr.mxu1 %v70_v45  ;;  %259 = vmatpush3.msra.mxu0 %v22_v46  ;;  %v235_v6 = vld [vmem:[%s538_s2] ss:$0 sm:$0xff] }
  0x1b   :  { %294 = vmatpush3.msra.mxu1 %v54_v47  ;;  %260 = vmatprep.subr.mxu0 %v37_v48 }
  0x1c   :  { %295 = vmatprep.subr.mxu1 %v69_v49  ;;  %261 = vmatpush3.msra.mxu0 %v21_v50 }
  0x1d   :  { %296 = vmatpush3.msra.mxu1 %v53_v51  ;;  %262 = vmatprep.subr.mxu0 %v36_v52 }
  0x1e   :  { %297 = vmatprep.subr.mxu1 %v68_v53  ;;  %263 = vmatpush3.msra.mxu0 %v20_v54 }
  0x1f   :  { %298 = vmatpush3.msra.mxu1 %v52_v55  ;;  %264 = vmatprep.subr.mxu0 %v35_v56 }
  0x20   :  { %299 = vmatprep.subr.mxu1 %v67_v57  ;;  %265 = vmatpush3.msra.mxu0 %v19_v58 }
  0x21   :  { %300 = vmatpush3.msra.mxu1 %v51_v59  ;;  %266 = vmatprep.subr.mxu0 %v34_v60 }
  0x22   :  { %301 = vmatprep.subr.mxu1 %v66_v61  ;;  %267 = vmatpush3.msra.mxu0 %v18_v62 }
  0x23   :  { %153 = vmatprep.mubr.f32.mxu0 %v15_v63  ;;  %302 = vmatpush3.msra.mxu1 %v50_v0 }
  0x24   :  { %223 = vmatprep.mubr.f32.mxu1 %v17_v1  ;;  %154 = vmatmul.mubr.f32.vlgmr.msra.gmra.mxu0 %v14_v2 }
  0x25   :  { %224 = vmatmul.mubr.f32.vlgmr.msra.gmra.mxu1 %v16_v3 }
  0xe4   :  { %v268_v4 = vpop.f32.mrf.mxu0 }
  0xe5   :  { %v303_v5 = vpop.f32.mrf.mxu1 }
  0xe6   :  { %v269_v7 = vpop.f32.mrf.mxu0 }
  0xe7   :  { %v304_v8 = vpop.f32.mrf.mxu1  ;;  %v270_v9 = vadd.f32 %v269_v7, %v268_v4 }
  0xe8   :  { %v305_v11 = vadd.f32 %v304_v8, %v303_v5 }
  0xe9   :  { %v156_v10 = vadd.f32 %v270_v9, %v235_v6 }
  0xeb   :  { %v226_v12 = vadd.f32 %v305_v11, %v156_v10 }
  0xed   :  { %230 = vst.msk [vmem:[%s539_s3] sm:$0xff] %vm229_vm0, %v226_v12 }

</bundles_post_ra>
